<compile_context>
chip_gen: v6e
topology: v6e:2x2x1
jax: 0.10.0
libtpu: 0.0.40
codegen_flags: <defaults>
</compile_context>

<pallas_src>
import functools

import jax
import jax.numpy as jnp
from jax.experimental import pallas as pl
from jax.experimental.pallas import tpu as pltpu


def _sigmoid(x):
    # sigmoid(x) == 0.5 * (1 + tanh(x / 2)): one EUP transcendental + cheap VPU ops.
    return 0.5 * jnp.tanh(0.5 * x) + 0.5


def _mlp_kernel(x_ref,
                w1_ref, b1_ref,
                w2_ref, b2_ref,
                w3_ref, b3_ref,
                w4_ref, b4_ref,
                o_ref):
    """Fused MLP: Linear->Sigmoid x3, then final Linear, one batch tile per step."""
    # Layer 1: bf16 MXU operands (cast in-kernel, hidden under the pipeline),
    # f32 accumulation; bias + sigmoid in f32.
    x = x_ref[...].astype(jnp.bfloat16)
    w1 = w1_ref[...].astype(jnp.bfloat16)
    h = jnp.dot(x, w1, preferred_element_type=jnp.float32) + b1_ref[...]
    h = _sigmoid(h)

    # Layer 2: (bm, 128) @ (128, 32) + (1, 32)   [f32 - tiny matmul]
    h = jnp.dot(h, w2_ref[...], preferred_element_type=jnp.float32) + b2_ref[...]
    h = _sigmoid(h)

    # Layer 3: (bm, 32) @ (32, 32) + (1, 32)
    h = jnp.dot(h, w3_ref[...], preferred_element_type=jnp.float32) + b3_ref[...]
    h = _sigmoid(h)

    # Layer 4 (no activation): (bm, 32) @ (32, 1) + (1, 1)
    out = jnp.dot(h, w4_ref[...], preferred_element_type=jnp.float32) + b4_ref[...]
    o_ref[...] = out.astype(o_ref.dtype)


def _choose_block_m(batch):
    """Rows per grid step.

    Large (up to 2048) to amortize the ~0.35 us per-grid-step overhead, a multiple
    of 8 (sublane), never larger than the batch (so only the last grid block is a
    partial block), and ~batch/2 when possible so >=2 tiles exist (v7x megacore).
    """
    if batch <= 16:
        return batch                         # whole (tiny) batch in one block
    half = -(-batch // 2)                    # ceil(batch / 2)
    bm = (half + 7) // 8 * 8                 # round up to a sublane multiple
    bm = min(bm, 2048, (batch // 8) * 8)     # cap; never exceed the batch
    return max(bm, 8)


@functools.partial(jax.jit, static_argnames=("block_m",))
def eval_function_forward(x, params, block_m=None):
    """Pallas implementation of Eval_function.forward.

    x: (batch, in_features) float32
    params: dict with w1..w4 stored as (in, out) and b1..b4 as (1, out), float32
    returns: (batch, 1) float32
    """
    B, F = x.shape
    if block_m is None:
        block_m = _choose_block_m(B)
    num_tiles = pl.cdiv(B, block_m)          # ragged tail -> partial last block

    w1, b1 = params["w1"], params["b1"]
    w2, b2 = params["w2"], params["b2"]
    w3, b3 = params["w3"], params["b3"]
    w4, b4 = params["w4"], params["b4"]

    def full(arr):
        # Whole weight/bias resident every grid step (constant index -> DMA'd once).
        return pl.BlockSpec(arr.shape, lambda i: (0,) * arr.ndim)

    flops = 2 * B * (F * 128 + 128 * 32 + 32 * 32 + 32 * 1)
    transcendentals = B * (128 + 32 + 32)
    bytes_accessed = (x.size * 4
                      + 4 * (w1.size + b1.size + w2.size + b2.size
                             + w3.size + b3.size + w4.size + b4.size)
                      + B * 4)

    out = pl.pallas_call(
        _mlp_kernel,
        out_shape=jax.ShapeDtypeStruct((B, 1), jnp.float32),
        grid_spec=pl.GridSpec(
            grid=(num_tiles,),
            in_specs=[
                pl.BlockSpec((block_m, F), lambda i: (i, 0)),   # x tile (f32)
                full(w1), full(b1),
                full(w2), full(b2),
                full(w3), full(b3),
                full(w4), full(b4),
            ],
            out_specs=pl.BlockSpec((block_m, 1), lambda i: (i, 0)),
        ),
        compiler_params=pltpu.CompilerParams(
            # Grid steps are independent -> shard across TensorCores (megacore).
            dimension_semantics=("parallel",),
        ),
        cost_estimate=pl.CostEstimate(
            flops=flops,
            transcendentals=transcendentals,
            bytes_accessed=bytes_accessed,
        ),
    )(x, w1, b1, w2, b2, w3, b3, w4, b4)

    return out


def init_params(key, in_features):
    """Deterministic parameter init matching nn.Linear shapes.

    PyTorch stores weight as (out, in); we store the transpose (in, out).
    """
    dims = [(in_features, 128), (128, 32), (32, 32), (32, 1)]
    params = {}
    for idx, (din, dout) in enumerate(dims, start=1):
        key, kw, kb = jax.random.split(key, 3)
        bound = 1.0 / jnp.sqrt(jnp.float32(din))  # same scale as nn.Linear default
        params[f"w{idx}"] = jax.random.uniform(
            kw, (din, dout), jnp.float32, minval=-bound, maxval=bound)
        params[f"b{idx}"] = jax.random.uniform(
            kb, (1, dout), jnp.float32, minval=-bound, maxval=bound)
    return params


def reference_forward(x, params):
    """Pure-JAX f32 reference mirroring the original PyTorch module exactly."""
    h = jax.nn.sigmoid(jnp.dot(x, params["w1"]) + params["b1"])
    h = jax.nn.sigmoid(jnp.dot(h, params["w2"]) + params["b2"])
    h = jax.nn.sigmoid(jnp.dot(h, params["w3"]) + params["b3"])
    return jnp.dot(h, params["w4"]) + params["b4"]


if __name__ == "__main__":
    key = jax.random.PRNGKey(0)
    in_features = 64   # flattened 8x8 chess-board feature vector
    batch = 24         # small; gives 2 grid tiles + a ragged last block (16 + 8 rows)

    k_param, k_x = jax.random.split(key)
    params = init_params(k_param, in_features)
    x = jax.random.normal(k_x, (batch, in_features), dtype=jnp.float32)

    out = eval_function_forward(x, params)
    out = jax.block_until_ready(out)

    ref = reference_forward(x, params)
    assert out.shape == (batch, 1)
    # Layer-1 runs with bf16 MXU operands (f32 accumulation); deviation from the
    # pure-f32 reference is ~1e-3 worst case at F=64.
    err = float(jnp.max(jnp.abs(out - ref)))
    assert err < 5e-3, f"mismatch vs f32 reference: max abs err = {err}"

    print("KERNEL_OK")
</pallas_src>

<mosaic_0001>
module attributes {stable_mosaic.version = 11 : i64} {
  func.func @_mlp_kernel(%arg0: i32, %arg1: memref<16x64xf32, #tpu.memory_space<vmem>>, %arg2: memref<64x128xf32, #tpu.memory_space<vmem>>, %arg3: memref<1x128xf32, #tpu.memory_space<vmem>>, %arg4: memref<128x32xf32, #tpu.memory_space<vmem>>, %arg5: memref<1x32xf32, #tpu.memory_space<vmem>>, %arg6: memref<32x32xf32, #tpu.memory_space<vmem>>, %arg7: memref<1x32xf32, #tpu.memory_space<vmem>>, %arg8: memref<32x1xf32, #tpu.memory_space<vmem>>, %arg9: memref<1x1xf32, #tpu.memory_space<vmem>>, %arg10: memref<16x1xf32, #tpu.memory_space<vmem>>) attributes {dimension_semantics = [#tpu.dimension_semantics<parallel>], iteration_bounds = array<i64: 2>, scalar_prefetch = 0 : i64, scratch_operands = 0 : i64, tpu.core_type = #tpu.core_type<tc>, window_params = [{transform_indices = @transform_0, window_bounds = array<i64: 16, 64>}, {pipeline_mode = #tpu.pipeline_mode<synchronous>, transform_indices = @transform_1, window_bounds = array<i64: 64, 128>}, {pipeline_mode = #tpu.pipeline_mode<synchronous>, transform_indices = @transform_2, window_bounds = array<i64: 1, 128>}, {pipeline_mode = #tpu.pipeline_mode<synchronous>, transform_indices = @transform_3, window_bounds = array<i64: 128, 32>}, {pipeline_mode = #tpu.pipeline_mode<synchronous>, transform_indices = @transform_4, window_bounds = array<i64: 1, 32>}, {pipeline_mode = #tpu.pipeline_mode<synchronous>, transform_indices = @transform_5, window_bounds = array<i64: 32, 32>}, {pipeline_mode = #tpu.pipeline_mode<synchronous>, transform_indices = @transform_6, window_bounds = array<i64: 1, 32>}, {pipeline_mode = #tpu.pipeline_mode<synchronous>, transform_indices = @transform_7, window_bounds = array<i64: 32, 1>}, {pipeline_mode = #tpu.pipeline_mode<synchronous>, transform_indices = @transform_8, window_bounds = array<i64: 1, 1>}, {transform_indices = @transform_9, window_bounds = array<i64: 16, 1>}]} {
    %c0 = arith.constant 0 : index
    %c0_0 = arith.constant 0 : index
    %0 = vector.load %arg1[%c0, %c0_0] : memref<16x64xf32, #tpu.memory_space<vmem>>, vector<16x64xf32>
    %1 = arith.truncf %0 : vector<16x64xf32> to vector<16x64xbf16>
    %c0_1 = arith.constant 0 : index
    %c0_2 = arith.constant 0 : index
    %2 = vector.load %arg2[%c0_1, %c0_2] : memref<64x128xf32, #tpu.memory_space<vmem>>, vector<64x128xf32>
    %3 = arith.truncf %2 : vector<64x128xf32> to vector<64x128xbf16>
    %cst = arith.constant dense<0.000000e+00> : vector<16x128xf32>
    %4 = tpu.matmul %1, %3, %cst {dimension_numbers = #tpu.dot_dimension_numbers<[1], [0], [0], [1], [0, 0, 1, 1], [], []>} : vector<16x64xbf16>, vector<64x128xbf16>, vector<16x128xf32> -> vector<16x128xf32>
    %c0_3 = arith.constant 0 : index
    %c0_4 = arith.constant 0 : index
    %5 = vector.load %arg3[%c0_3, %c0_4] : memref<1x128xf32, #tpu.memory_space<vmem>>, vector<1x128xf32>
    %6 = vector.broadcast %5 : vector<1x128xf32> to vector<16x128xf32>
    %7 = arith.addf %4, %6 : vector<16x128xf32>
    %cst_5 = arith.constant 5.000000e-01 : f32
    %8 = vector.broadcast %cst_5 : f32 to vector<16x128xf32>
    %9 = arith.mulf %8, %7 : vector<16x128xf32>
    %10 = math.tanh %9 : vector<16x128xf32>
    %cst_6 = arith.constant 5.000000e-01 : f32
    %11 = vector.broadcast %cst_6 : f32 to vector<16x128xf32>
    %12 = arith.mulf %11, %10 : vector<16x128xf32>
    %cst_7 = arith.constant 5.000000e-01 : f32
    %13 = vector.broadcast %cst_7 : f32 to vector<16x128xf32>
    %14 = arith.addf %12, %13 : vector<16x128xf32>
    %c0_8 = arith.constant 0 : index
    %c0_9 = arith.constant 0 : index
    %15 = vector.load %arg4[%c0_8, %c0_9] : memref<128x32xf32, #tpu.memory_space<vmem>>, vector<128x32xf32>
    %cst_10 = arith.constant dense<0.000000e+00> : vector<16x32xf32>
    %16 = tpu.matmul %14, %15, %cst_10 {dimension_numbers = #tpu.dot_dimension_numbers<[1], [0], [0], [1], [0, 0, 1, 1], [], []>} : vector<16x128xf32>, vector<128x32xf32>, vector<16x32xf32> -> vector<16x32xf32>
    %c0_11 = arith.constant 0 : index
    %c0_12 = arith.constant 0 : index
    %17 = vector.load %arg5[%c0_11, %c0_12] : memref<1x32xf32, #tpu.memory_space<vmem>>, vector<1x32xf32>
    %18 = vector.broadcast %17 : vector<1x32xf32> to vector<16x32xf32>
    %19 = arith.addf %16, %18 : vector<16x32xf32>
    %cst_13 = arith.constant 5.000000e-01 : f32
    %20 = vector.broadcast %cst_13 : f32 to vector<16x32xf32>
    %21 = arith.mulf %20, %19 : vector<16x32xf32>
    %22 = math.tanh %21 : vector<16x32xf32>
    %cst_14 = arith.constant 5.000000e-01 : f32
    %23 = vector.broadcast %cst_14 : f32 to vector<16x32xf32>
    %24 = arith.mulf %23, %22 : vector<16x32xf32>
    %cst_15 = arith.constant 5.000000e-01 : f32
    %25 = vector.broadcast %cst_15 : f32 to vector<16x32xf32>
    %26 = arith.addf %24, %25 : vector<16x32xf32>
    %c0_16 = arith.constant 0 : index
    %c0_17 = arith.constant 0 : index
    %27 = vector.load %arg6[%c0_16, %c0_17] : memref<32x32xf32, #tpu.memory_space<vmem>>, vector<32x32xf32>
    %cst_18 = arith.constant dense<0.000000e+00> : vector<16x32xf32>
    %28 = tpu.matmul %26, %27, %cst_18 {dimension_numbers = #tpu.dot_dimension_numbers<[1], [0], [0], [1], [0, 0, 1, 1], [], []>} : vector<16x32xf32>, vector<32x32xf32>, vector<16x32xf32> -> vector<16x32xf32>
    %c0_19 = arith.constant 0 : index
    %c0_20 = arith.constant 0 : index
    %29 = vector.load %arg7[%c0_19, %c0_20] : memref<1x32xf32, #tpu.memory_space<vmem>>, vector<1x32xf32>
    %30 = vector.broadcast %29 : vector<1x32xf32> to vector<16x32xf32>
    %31 = arith.addf %28, %30 : vector<16x32xf32>
    %cst_21 = arith.constant 5.000000e-01 : f32
    %32 = vector.broadcast %cst_21 : f32 to vector<16x32xf32>
    %33 = arith.mulf %32, %31 : vector<16x32xf32>
    %34 = math.tanh %33 : vector<16x32xf32>
    %cst_22 = arith.constant 5.000000e-01 : f32
    %35 = vector.broadcast %cst_22 : f32 to vector<16x32xf32>
    %36 = arith.mulf %35, %34 : vector<16x32xf32>
    %cst_23 = arith.constant 5.000000e-01 : f32
    %37 = vector.broadcast %cst_23 : f32 to vector<16x32xf32>
    %38 = arith.addf %36, %37 : vector<16x32xf32>
    %c0_24 = arith.constant 0 : index
    %c0_25 = arith.constant 0 : index
    %39 = vector.load %arg8[%c0_24, %c0_25] : memref<32x1xf32, #tpu.memory_space<vmem>>, vector<32x1xf32>
    %cst_26 = arith.constant dense<0.000000e+00> : vector<16x1xf32>
    %40 = tpu.matmul %38, %39, %cst_26 {dimension_numbers = #tpu.dot_dimension_numbers<[1], [0], [0], [1], [0, 0, 1, 1], [], []>} : vector<16x32xf32>, vector<32x1xf32>, vector<16x1xf32> -> vector<16x1xf32>
    %c0_27 = arith.constant 0 : index
    %c0_28 = arith.constant 0 : index
    %41 = vector.load %arg9[%c0_27, %c0_28] : memref<1x1xf32, #tpu.memory_space<vmem>>, vector<1x1xf32>
    %42 = vector.broadcast %41 : vector<1x1xf32> to vector<16x1xf32>
    %43 = arith.addf %40, %42 : vector<16x1xf32>
    %c0_29 = arith.constant 0 : index
    %c0_30 = arith.constant 0 : index
    %44 = vector.load %arg10[%c0_29, %c0_30] : memref<16x1xf32, #tpu.memory_space<vmem>>, vector<16x1xf32>
    tpu.vector_store %arg10[%c0_29, %c0_30], %43 {strides = array<i32>} : memref<16x1xf32, #tpu.memory_space<vmem>>, vector<16x1xf32>,
    return
  }
  func.func @transform_0(%arg0: i32) -> (i32, i32) {
    %c0_i32 = arith.constant 0 : i32
    %c0_i32_0 = arith.constant 0 : i32
    return %arg0, %c0_i32 : i32, i32
  }
  func.func @transform_1(%arg0: i32) -> (i32, i32) {
    %c0_i32 = arith.constant 0 : i32
    %c0_i32_0 = arith.constant 0 : i32
    %c0_i32_1 = arith.constant 0 : i32
    return %c0_i32, %c0_i32_0 : i32, i32
  }
  func.func @transform_2(%arg0: i32) -> (i32, i32) {
    %c0_i32 = arith.constant 0 : i32
    %c0_i32_0 = arith.constant 0 : i32
    %c0_i32_1 = arith.constant 0 : i32
    return %c0_i32, %c0_i32_0 : i32, i32
  }
  func.func @transform_3(%arg0: i32) -> (i32, i32) {
    %c0_i32 = arith.constant 0 : i32
    %c0_i32_0 = arith.constant 0 : i32
    %c0_i32_1 = arith.constant 0 : i32
    return %c0_i32, %c0_i32_0 : i32, i32
  }
  func.func @transform_4(%arg0: i32) -> (i32, i32) {
    %c0_i32 = arith.constant 0 : i32
    %c0_i32_0 = arith.constant 0 : i32
    %c0_i32_1 = arith.constant 0 : i32
    return %c0_i32, %c0_i32_0 : i32, i32
  }
  func.func @transform_5(%arg0: i32) -> (i32, i32) {
    %c0_i32 = arith.constant 0 : i32
    %c0_i32_0 = arith.constant 0 : i32
    %c0_i32_1 = arith.constant 0 : i32
    return %c0_i32, %c0_i32_0 : i32, i32
  }
  func.func @transform_6(%arg0: i32) -> (i32, i32) {
    %c0_i32 = arith.constant 0 : i32
    %c0_i32_0 = arith.constant 0 : i32
    %c0_i32_1 = arith.constant 0 : i32
    return %c0_i32, %c0_i32_0 : i32, i32
  }
  func.func @transform_7(%arg0: i32) -> (i32, i32) {
    %c0_i32 = arith.constant 0 : i32
    %c0_i32_0 = arith.constant 0 : i32
    %c0_i32_1 = arith.constant 0 : i32
    return %c0_i32, %c0_i32_0 : i32, i32
  }
  func.func @transform_8(%arg0: i32) -> (i32, i32) {
    %c0_i32 = arith.constant 0 : i32
    %c0_i32_0 = arith.constant 0 : i32
    %c0_i32_1 = arith.constant 0 : i32
    return %c0_i32, %c0_i32_0 : i32, i32
  }
  func.func @transform_9(%arg0: i32) -> (i32, i32) {
    %c0_i32 = arith.constant 0 : i32
    %c0_i32_0 = arith.constant 0 : i32
    return %arg0, %c0_i32 : i32, i32
  }
}

</mosaic_0001>

<bundles_post_ra>
// kernel: eval_function_forward.1
= control target key start
LH: loop header
LB: loop body
LE: loop exit
PB: predicated region body
PF: predicated region fallthrough
CT: control target
= control target key end

     0   :  { %s1531_s0 = inlined_call_operand.vmem [shape: f32[24,64], index: 0, kind: input, shape index: {}]   ;;  %s1532_s1 = inlined_call_operand.vmem [shape: f32[64,128], index: 1, kind: input, shape index: {}]   ;;  %s1533_s2 = inlined_call_operand.vmem [shape: f32[1,128], index: 2, kind: input, shape index: {}]   ;;  %s1534_s3 = inlined_call_operand.vmem [shape: f32[128,32], index: 3, kind: input, shape index: {}]   ;;  %s1535_s4 = inlined_call_operand.vmem [shape: f32[1,32], index: 4, kind: input, shape index: {}]   ;;  %s1536_s5 = inlined_call_operand.vmem [shape: f32[32,32], index: 5, kind: input, shape index: {}]   ;;  %s1537_s6 = inlined_call_operand.vmem [shape: f32[1,32], index: 6, kind: input, shape index: {}]   ;;  %s1538_s7 = inlined_call_operand.vmem [shape: f32[32,1], index: 7, kind: input, shape index: {}]   ;;  %s1539_s8 = inlined_call_operand.<no memory space> [shape: f32[1,1], index: 8, kind: input, shape index: {}]   ;;  %s1540_s9 = inlined_call_operand.vmem [shape: f32[24,1], index: 9, kind: output, shape index: {}]  }
   0x1   :  { %v14_v0 = vstv %s1539_s8 }
   0x2   :  { %15 = vst [vmem:[#allocation2] sm:$0x1] %v14_v0 }
   0x3   :  { %s1339_s11 = smov 0   ;;  %s1341_s12 = smov 0  }
   0x4   :  { %s1343_s13 = smov 0  }
   0x5 LB: > { %s1352_s8 = sadd.s32 4294967295, %s1250_s13   ;;  %s1354_s14 = sadd.s32 1, %s1250_s13   ;;  %s1250_s13 = sphi %s1343_s13, %s1544_s13   ;;  %s1246_s12 = sphi %s1341_s12, %s1543_s12   ;;  %s1242_s11 = sphi %s1339_s11, %s1542_s11  }
   0x6   : > { %s219_s15 = ssub.s32 %s1250_s13, %s1354_s14  ;;  %s222_s16 = sadd.s32 1, %s1246_s12 }
   0x7   : > { %p220_p0 = scmp.eq.s32.totalorder %s219_s15, 0  ;;  %p232_p1 = scmp.ne.s32.totalorder %s1246_s12, %s1242_s11 }
   0x8   : > { %p233_p2 = scmp.eq.s32.totalorder %s1352_s8, 1  ;;  %p957_p3 = scmp.ge.s32.totalorder %s1250_s13, 1 }
   0x9   : > { %s1362_s17 = scalar_select %p220_p0, %s1246_s12, %s222_s16  }
   0xa   : > { %p1364_p4 = por %p233_p2, %p232_p1  ;;  %p298_p5 = scmp.lt.s32.totalorder %s1250_s13, 3 }
   0xc   : > { %p299_p6 = pnand %p957_p3, %p298_p5 }
   0xd   : > { %s1378_s25 = sshll.u32 (!%p299_p6), %s1352_s8, 1  ;;  %s334_s19 = sand.u32 (!%p299_p6), 1, %s1242_s11  }
   0xe   : > { %302 = sbr.rel (%p299_p6) target bundleno = 929 (0x3a1), region = 56  ;;  %p342_p7 = scmp.lt.s32.totalorder (!%p299_p6), %s1378_s25, 2 }
   0xf   : > { %s958_s20 = sshll.u32 (!%p299_p6), %s334_s19, 4 }
  0x10   : > { %s1486_s21 = scalar_lea.vmem (!%p299_p6), [#allocation3], %s958_s20  }
  0x13   : > { %v366_v1 = vld [vmem:[%s1532_s1 + $0x30] sm:$0xff]  ;;  %v367_v2 = vld [vmem:[%s1532_s1 + $0x38] sm:$0xff]  ;;  %v364_v3 = vld [vmem:[%s1532_s1 + $0x20] sm:$0xff]  ;;  %v1284_v4 = vmov 0.0   ;;  %vm1285_vm0 = vmmov 0   ;;  %s343_s30 = scalar_select %p342_p7, %s1378_s25, 2 }
  0x14   : > { %1025 = vmatprep.subr.bf16.mxu0 %v1284_v4  ;;  %v371_v5 = vpack.c.bf16 %v367_v2, %v366_v1  ;;  %v365_v6 = vld [vmem:[%s1532_s1 + $0x28] sm:$0xff]  ;;  %1033 = vmatprep.mubr.msk.bf16.mxu0 %vm1285_vm0, %v1284_v4  ;;  %v447_v7 = vld [vmem:[%s1534_s3 + $0x78] sm:$0xff]  ;;  %v446_v9 = vld [vmem:[%s1534_s3 + $0x70] sm:$0xff]  ;;  %vm379_vm1 = vcmask 523264   ;;  %vm549_vm2 = vcmask 261120   ;;  %vm731_vm3 = vcmask 7168  }
  0x15   : > { %v370_v8 = vpack.c.bf16 %v365_v6, %v364_v3  ;;  %1037 = vmatprep.subr.mxu1 %v447_v7  ;;  %v362_v10 = vld [vmem:[%s1532_s1 + $0x10] sm:$0xff]  ;;  %v363_v11 = vld [vmem:[%s1532_s1 + $0x18] sm:$0xff]  ;;  %v445_v12 = vld [vmem:[%s1534_s3 + $0x68] sm:$0xff]  ;;  %s960_s23 = sshll.u32 %s343_s30, 3  ;;  %s742_s22 = ssub.s32 (%p1364_p4), 3, %s1378_s25 }
  0x16   : > { %1026 = vmatpush3.bf16.msra.mxu0 %v371_v5  ;;  %1038 = vmatpush3.msra.mxu1 %v447_v7  ;;  %v369_v13 = vpack.c.bf16 %v363_v11, %v362_v10  ;;  %v360_v14 = vld [vmem:[%s1532_s1] sm:$0xff]  ;;  %v361_v15 = vld [vmem:[%s1532_s1 + $0x8] sm:$0xff]  ;;  %s345_s13 = scalar_lea.vmem %s1531_s0, %s960_s23  ;;  %v443_v21 = vld [vmem:[%s1534_s3 + $0x58] sm:$0xff]  ;;  %s987_s11 = sshll.u32 (%p1364_p4), %s1352_s8, 4 }
  0x17   : > { %1027 = vmatprep.subr.bf16.mxu0 %v1284_v4  ;;  %1039 = vmatprep.subr.mxu1 %v446_v9  ;;  %v368_v16 = vpack.c.bf16 %v361_v15, %v360_v14  ;;  %v357_v17 = vld [vmem:[%s345_s13] sm:$0xff]  ;;  %v358_v18 = vld [vmem:[%s345_s13 + $0x8] sm:$0xff]  ;;  %v442_v22 = vld [vmem:[%s1534_s3 + $0x50] sm:$0xff]  ;;  %p743_p8 = scmp.lt.s32.totalorder (%p1364_p4), %s742_s22, 2  ;;  %s1497_s26 = scalar_lea.vmem (%p1364_p4), %s1540_s9, %s987_s11  }
  0x18   : > { %1040 = vmatpush3.msra.mxu1 %v446_v9  ;;  %v359_v19 = vpack.c.bf16 %v358_v18, %v357_v17  ;;  %v444_v20 = vld [vmem:[%s1534_s3 + $0x60] sm:$0xff]  ;;  %v441_v23 = vld [vmem:[%s1534_s3 + $0x48] sm:$0xff]  ;;  %v439_v25 = vld [vmem:[%s1534_s3 + $0x38] sm:$0xff] }
  0x19   : > { %1041 = vmatprep.subr.mxu1 %v445_v12  ;;  %v440_v24 = vld [vmem:[%s1534_s3 + $0x40] sm:$0xff]  ;;  %v438_v26 = vld [vmem:[%s1534_s3 + $0x30] sm:$0xff]  ;;  %v437_v27 = vld [vmem:[%s1534_s3 + $0x28] sm:$0xff] }
  0x1a   : > { %1028 = vmatpush3.bf16.msra.mxu0 %v370_v8  ;;  %1042 = vmatpush3.msra.mxu1 %v445_v12  ;;  %v436_v28 = vld [vmem:[%s1534_s3 + $0x20] sm:$0xff]  ;;  %v435_v29 = vld [vmem:[%s1534_s3 + $0x18] sm:$0xff]  ;;  %v434_v30 = vld [vmem:[%s1534_s3 + $0x10] sm:$0xff] }
  0x1b   : > { %1029 = vmatprep.subr.bf16.mxu0 %v1284_v4  ;;  %1043 = vmatprep.subr.mxu1 %v444_v20  ;;  %v433_v31 = vld [vmem:[%s1534_s3 + $0x8] sm:$0xff]  ;;  %v432_v32 = vld [vmem:[%s1534_s3] sm:$0xff]  ;;  %v541_v48 = vld [vmem:[%s1536_s5 + $0x18] sm:$0xff] }
  0x1c   : > { %1044 = vmatpush3.msra.mxu1 %v444_v20  ;;  %v961_v33 = vld [vmem:[%s1533_s2] ss:$0 sm:$0xff]  ;;  %v540_v49 = vld [vmem:[%s1536_s5 + $0x10] sm:$0xff]  ;;  %v539_v50 = vld [vmem:[%s1536_s5 + $0x8] sm:$0xff] }
  0x1d   : > { %1045 = vmatprep.subr.mxu1 %v443_v21  ;;  %v538_v51 = vld [vmem:[%s1536_s5] sm:$0xff]  ;;  %v642_v1 = vld [vmem:[%s1538_s7 + $0x18] sm:$0xff]  ;;  %v641_v2 = vld [vmem:[%s1538_s7 + $0x10] sm:$0xff] }
  0x1e   : > { %1030 = vmatpush3.bf16.msra.mxu0 %v369_v13  ;;  %1046 = vmatpush3.msra.mxu1 %v443_v21  ;;  %v963_v52 = vld [vmem:[%s1535_s4] ss:$0 sm:$0xff]  ;;  %v640_v3 = vld [vmem:[%s1538_s7 + $0x8] sm:$0xff] }
  0x1f   : > { %1031 = vmatprep.subr.bf16.mxu0 %v1284_v4  ;;  %1047 = vmatprep.subr.mxu1 %v442_v22  ;;  %v639_v4 = vld [vmem:[%s1538_s7] sm:$0xff] }
  0x20   : > { %1048 = vmatpush3.msra.mxu1 %v442_v22  ;;  %v964_v5 = vld [vmem:[%s1537_s6] ss:$0 sm:$0xff] }
  0x21   : > { %1049 = vmatprep.subr.mxu1 %v441_v23  ;;  %v967_v18 = vld [vmem:[#allocation2] ss:$0 sm:$0xff] }
  0x22   : > { %1032 = vmatpush3.bf16.msra.mxu0 %v368_v16  ;;  %1050 = vmatpush3.msra.mxu1 %v441_v23 }
  0x23   : > { %1051 = vmatprep.subr.mxu1 %v440_v24  ;;  %1072 = vmatprep.subr.mxu0 %v541_v48 }
  0x24   : > { %1052 = vmatpush3.msra.mxu1 %v440_v24 }
  0x25   : > { %1034 = vmatmul.mubr.msk.bf16.vlgmr.msra.gmra.mxu0 %vm379_vm1, %v359_v19  ;;  %1053 = vmatprep.subr.mxu1 %v439_v25 }
  0x26   : > { %1054 = vmatpush3.msra.mxu1 %v439_v25  ;;  %1073 = vmatpush3.msra.mxu0 %v541_v48 }
  0x27   : > { %1055 = vmatprep.subr.mxu1 %v438_v26  ;;  %1074 = vmatprep.subr.mxu0 %v540_v49 }
  0x28   : > { %1056 = vmatpush3.msra.mxu1 %v438_v26  ;;  %1075 = vmatpush3.msra.mxu0 %v540_v49 }
  0x29   : > { %1057 = vmatprep.subr.mxu1 %v437_v27  ;;  %1076 = vmatprep.subr.mxu0 %v539_v50 }
  0x2a   : > { %1058 = vmatpush3.msra.mxu1 %v437_v27  ;;  %1077 = vmatpush3.msra.mxu0 %v539_v50 }
  0x2b   : > { %1059 = vmatprep.subr.mxu1 %v436_v28  ;;  %1078 = vmatprep.subr.mxu0 %v538_v51 }
  0x2c   : > { %1060 = vmatpush3.msra.mxu1 %v436_v28  ;;  %1079 = vmatpush3.msra.mxu0 %v538_v51 }
  0x2d   : > { %1061 = vmatprep.subr.mxu1 %v435_v29  ;;  %1083 = vmatprep.subr.mxu0 %v642_v1 }
  0x2e   : > { %1062 = vmatpush3.msra.mxu1 %v435_v29 }
  0x2f   : > { %1063 = vmatprep.subr.mxu1 %v434_v30 }
  0x30   : > { %1064 = vmatpush3.msra.mxu1 %v434_v30 }
  0x31   : > { %1065 = vmatprep.subr.mxu1 %v433_v31 }
  0x32   : > { %1066 = vmatpush3.msra.mxu1 %v433_v31 }
  0x33   : > { %1067 = vmatprep.subr.mxu1 %v432_v32 }
  0x34   : > { %1068 = vmatpush3.msra.mxu1 %v432_v32 }
  0xe5   : > { %v417_v34 = vpop.f32.mrf.mxu0 }
  0xe6   : > { %v418_v35 = vadd.f32 %v961_v33, %v417_v34 }
  0xe7   : > { %v1035_v36 = vpop.f32.mrf.mxu0 }
  0xe8   : > { %v424_v37 = vmul.f32 0.5, %v418_v35 }
  0xe9   : > { %v420_v38 = vpop.f32.mrf.mxu0 }
  0xea   : > { %1184 = vtanh.f32 %v424_v37  ;;  %v421_v39 = vadd.f32 %v961_v33, %v420_v38 }
  0xeb   : > { %v1036_v40 = vpop.f32.mrf.mxu0 }
  0xec   : > { %v425_v41 = vmul.f32 0.5, %v421_v39 }
  0xee   : > { %1186 = vtanh.f32 %v425_v41 }
  0xf7   : > { %v1185_v42 = vpop.eup %1184 }
  0xf8   : > { %v428_v43 = vmul.f32 0.5, %v1185_v42 }
  0xfa   : > { %v430_v44 = vadd.f32 0.5, %v428_v43 }
  0xfb   : > { %v1187_v45 = vpop.eup %1186 }
  0xfc   : > { %1069 = vmatprep.mubr.f32.mxu1 %v430_v44  ;;  %v429_v46 = vmul.f32 0.5, %v1187_v45 }
  0xfe   : > { %v431_v47 = vadd.f32 0.5, %v429_v46 }
 0x100   : > { %1070 = vmatmul.mubr.f32.vlgmr.msra.gmra.mxu1 %v431_v47 }
 0x1c0   : > { %v1071_v53 = vpop.f32.mrf.mxu1 }
 0x1c1   : > { %v527_v54 = vadd.f32 %v1071_v53, %v963_v52 }
 0x1c2   : > { %v521_v55 = vpop.f32.mrf.mxu1 }
 0x1c3   : > { %v531_v56 = vmul.f32 0.5, %v527_v54  ;;  %v522_v57 = vadd.f32 %v963_v52, %v521_v55 }
 0x1c5   : > { %1188 = vtanh.f32 %v531_v56  ;;  %v530_v58 = vmul.f32 0.5, %v522_v57 }
 0x1c7   : > { %1190 = vtanh.f32 %v530_v58 }
 0x1d2   : > { %v1189_v59 = vpop.eup %1188 }
 0x1d3   : > { %v535_v61 = vmul.f32 0.5, %v1189_v59 }
 0x1d4   : > { %v1191_v60 = vpop.eup %1190 }
 0x1d5   : > { %v534_v62 = vmul.f32 0.5, %v1191_v60  ;;  %v537_v0 = vadd.f32 0.5, %v535_v61 }
 0x1d7   : > { %v536_v63 = vadd.f32 0.5, %v534_v62 }
 0x1d9   : > { %1080 = vmatprep.mubr.msk.f32.mxu0 %vm549_vm2, %v536_v63 }
 0x1da   : > { %1081 = vmatmul.mubr.msk.f32.vlgmr.msra.gmra.mxu0 %vm549_vm2, %v537_v0 }
 0x1db   : > { %1084 = vmatpush3.msra.mxu0 %v642_v1 }
 0x1dc   : > { %1085 = vmatprep.subr.mxu0 %v641_v2 }
 0x1dd   : > { %1086 = vmatpush3.msra.mxu0 %v641_v2 }
 0x1de   : > { %1087 = vmatprep.subr.mxu0 %v640_v3 }
 0x1df   : > { %1088 = vmatpush3.msra.mxu0 %v640_v3 }
 0x1e0   : > { %1089 = vmatprep.subr.mxu0 %v639_v4 }
 0x1e1   : > { %1090 = vmatpush3.msra.mxu0 %v639_v4 }
 0x29a   : > { %v1082_v6 = vpop.f32.mrf.mxu0 }
 0x29b   : > { %v628_v7 = vadd.f32 %v1082_v6, %v964_v5 }
 0x29c   : > { %v622_v8 = vpop.f32.mrf.mxu0 }
 0x29d   : > { %v632_v9 = vmul.f32 0.5, %v628_v7  ;;  %v623_v10 = vadd.f32 %v964_v5, %v622_v8 }
 0x29f   : > { %1192 = vtanh.f32 %v632_v9  ;;  %v631_v11 = vmul.f32 0.5, %v623_v10 }
 0x2a1   : > { %1194 = vtanh.f32 %v631_v11 }
 0x2ac   : > { %v1193_v12 = vpop.eup %1192 }
 0x2ad   : > { %v636_v14 = vmul.f32 0.5, %v1193_v12 }
 0x2ae   : > { %v1195_v13 = vpop.eup %1194 }
 0x2af   : > { %v635_v15 = vmul.f32 0.5, %v1195_v13  ;;  %v638_v17 = vadd.f32 0.5, %v636_v14 }
 0x2b1   : > { %v637_v16 = vadd.f32 0.5, %v635_v15 }
 0x2b3   : > { %1091 = vmatprep.mubr.msk.f32.mxu0 %vm549_vm2, %v637_v16 }
 0x2b4   : > { %1092 = vmatmul.mubr.msk.f32.vlgmr.msra.gmra.mxu0 %vm549_vm2, %v638_v17 }
 0x374   : > { %v1093_v19 = vpop.f32.mrf.mxu0 }
 0x375   : > { %v728_v20 = vadd.f32 %v1093_v19, %v967_v18  ;;  %740 = sbr.rel (!%p1364_p4) target bundleno = 929 (0x3a1), region = 60 }
 0x376   : > { %v722_v21 = vpop.f32.mrf.mxu0 }
 0x377   : > { %733 = vst.msk [vmem:[%s1486_s21 + $0x8] sm:$0xff] %vm731_vm3, %v728_v20  ;;  %v723_v22 = vadd.f32 %v967_v18, %v722_v21 }
 0x379   : > { %732 = vst.msk [vmem:[%s1486_s21] sm:$0xff] %vm731_vm3, %v723_v22 }
 0x37a   : > { %s1546_s22 = smov (!%p743_p8, %s742_s22), 2 }
 0x37b   : > { %s972_s27 = sshll.u32 %s1546_s22, 7 }
 0x37c   : > { %p975_p9 = scmp.eq.s32.totalorder %s972_s27, 0 }
 0x37d   : > { %s1503_s28 = sshrl.u32 (!%p975_p9), %s1546_s22, 1 }
 0x37e   : > { %751 = sbr.rel (%p975_p9) target bundleno = 929 (0x3a1), region = 64  ;;  %p976_p10 = scmp.le.s32.totalorder (!%p975_p9), %s1503_s28, 0 }
 0x383   : > { %910 = sbr.rel (%p976_p10) target bundleno = 912 (0x390), region = 140  ;;  %s1252_s8 = smov (!%p976_p10), %s1497_s26  }
 0x384   : > { %s1256_s18 = smov (!%p976_p10), %s1486_s21   ;;  %s1260_s25 = smov (!%p976_p10), 0  }
 0x385   : > { %s1264_s29 = smov (!%p976_p10), 0  }
 0x388 LB: >> { %v816_v23 = vld [vmem:[%s1258_s18] sm:$0xff]  ;;  %v818_v24 = vld [vmem:[%s1258_s18 + $0x8] sm:$0xff]  ;;  %s820_s10 = sadd.s32 1, %s1262_s25  ;;  %s810_s29 = sadd.s32 1, %s1266_s29   ;;  %s1266_s29 = sphi %s1264_s29, %s810_s29   ;;  %s1262_s25 = sphi %s1260_s25, %s1261_s25   ;;  %s1258_s18 = sphi %s1256_s18, %s825_s18   ;;  %s1254_s8 = sphi %s1252_s8, %s826_s8  }
 0x389   : >> { %817 = vst [vmem:[%s1254_s8] sm:$0xff] %v816_v23  ;;  %819 = vst [vmem:[%s1254_s8 + $0x8] sm:$0xff] %v818_v24  ;;  %p821_p11 = scmp.ge.s32.totalorder %s820_s10, %s1503_s28  ;;  %p809_p12 = scmp.ge.s32.totalorder %s810_s29, %s1503_s28 }
 0x38b   : >> { %s1548_s10 = smov (%p821_p11, %s820_s10), 0  ;;  %812 = sbr.rel (!%p809_p12) target bundleno = 904 (0x388), region = 146 }
 0x38c   : >> { %s977_s13 = sshll.u32 %s1548_s10, 4  ;;  %s1261_s25 = smov %s1548_s10  }
 0x38d   : >> { %s825_s18 = scalar_lea.vmem %s1486_s21, %s977_s13 [#allocation3]   ;;  %s826_s8 = scalar_lea.vmem %s1497_s26, %s977_s13  }
 0x390 PF: > { %s1513_s30 = sand.u32 1, %s1546_s22   ;;  %s988_s15 = sshll.u32 %s1503_s28, 4 }
 0x391   : > { %s831_s16 = scalar_lea.vmem %s1486_s21, %s988_s15 [#allocation3]   ;;  %s833_s19 = scalar_lea.vmem %s1497_s26, %s988_s15  }
 0x392   : > { %p982_p13 = scmp.le.s32.totalorder %s1513_s30, 0 }
 0x393   : > { %s1268_s20 = smov (!%p982_p13), %s833_s19   ;;  %s1272_s11 = smov (!%p982_p13), %s831_s16  }
 0x394   : > { %924 = sbr.rel (%p982_p13) target bundleno = 929 (0x3a1), region = 151  ;;  %s1276_s23 = smov (!%p982_p13), 0  }
 0x395   : > { %s1280_s24 = smov (!%p982_p13), 0  }
 0x399 LB: >> { %v843_v25 = vld [vmem:[%s1274_s11] sm:$0xff]  ;;  %s845_s22 = sadd.s32 1, %s1278_s23  ;;  %s837_s24 = sadd.s32 1, %s1282_s24   ;;  %s1282_s24 = sphi %s1280_s24, %s837_s24   ;;  %s1278_s23 = sphi %s1276_s23, %s1277_s23   ;;  %s1274_s11 = sphi %s1272_s11, %s850_s11   ;;  %s1270_s20 = sphi %s1268_s20, %s851_s20  }
 0x39a   : >> { %844 = vst [vmem:[%s1270_s20] sm:$0xff] %v843_v25  ;;  %p846_p0 = scmp.ge.s32.totalorder %s845_s22, %s1513_s30  ;;  %p836_p1 = scmp.ge.s32.totalorder %s837_s24, %s1513_s30 }
 0x39c   : >> { %s1550_s22 = smov (%p846_p0, %s845_s22), 0  ;;  %839 = sbr.rel (!%p836_p1) target bundleno = 921 (0x399), region = 157 }
 0x39d   : >> { %s983_s21 = sshll.u32 %s1550_s22, 3  ;;  %s1277_s23 = smov %s1550_s22  }
 0x39e   : >> { %s850_s11 = scalar_lea.vmem %s831_s16, %s983_s21 [#allocation3]   ;;  %s851_s20 = scalar_lea.vmem %s833_s19, %s983_s21  }
 0x3a1 PF: > { %p18_p2 = scmp.ge.s32.totalorder %s1354_s14, 4   ;;  %s1542_s11 = smov %s1246_s12 }
 0x3a2   : > { %s1543_s12 = smov %s1362_s17  ;;  %s1544_s13 = smov %s1354_s14 }
 0x3a3   :  { %20 = sbr.rel (!%p18_p2) target bundleno = 5 (0x5), region = 168 }

</bundles_post_ra>
